<compile_context>
chip_gen: v7x
topology: tpu7x:2x2x1
jax: 0.10.0
libtpu: 0.0.40
codegen_flags: <defaults>
</compile_context>

<pallas_src>
import jax
import jax.numpy as jnp
from jax.experimental import pallas as pl
from jax.experimental.pallas import tpu as pltpu

_D_IN = 6
_H1 = 128
_H2 = 64
_D_OUT = 3
_OUT_PAD = 128  # pad the 3-wide final layer to 128 lanes -> unmasked stores


def _round_up(n, m):
    return ((n + m - 1) // m) * m


def mlp_kernel(x_ref, w1_ref, b1_ref, w2_ref, b2_ref, w3_ref, b3_ref, o_ref):
    # One (tm, 6) batch tile; all weights resident in VMEM across grid steps.
    # Matmul operands are in the weights' dtype (f32 or bf16); accumulation,
    # bias-add and ReLU are in f32.  Biases are (1, N) rows that broadcast
    # along the batch (sublane) axis — broadcast happens once per invocation.
    cdt = w1_ref.dtype

    h1 = jnp.dot(x_ref[...], w1_ref[...], preferred_element_type=jnp.float32)
    h1 = jnp.maximum(h1 + b1_ref[...], 0.0)

    h2 = jnp.dot(h1.astype(cdt), w2_ref[...], preferred_element_type=jnp.float32)
    h2 = jnp.maximum(h2 + b2_ref[...], 0.0)

    h3 = jnp.dot(h2.astype(cdt), w3_ref[...], preferred_element_type=jnp.float32)
    o_ref[...] = (h3 + b3_ref[...]).astype(o_ref.dtype)


def simple_nn_forward(x, params, *, tm_max=1024, compute_dtype=jnp.float32):
    """x: (..., 6) -> (B, 3) float32, B = prod(leading dims) (matches x.view(-1, 6)).

    compute_dtype: dtype of the matmul operands (jnp.float32 everywhere, or
    jnp.bfloat16 on v6e/v7x for MXU-native operands; accumulation is f32).
    """
    w1, b1, w2, b2, w3, b3 = params

    x2 = x.reshape(-1, _D_IN).astype(jnp.float32)
    B = x2.shape[0]

    # --- batch tiling: big tiles, pad instead of asserting divisibility ------
    tm = min(_round_up(max(B, 1), 8), tm_max)
    B_pad = _round_up(B, tm)
    if B_pad != B:
        x2 = jnp.pad(x2, ((0, B_pad - B), (0, 0)))
    grid = (pl.cdiv(B_pad, tm),)

    # --- operand prep: lane-dense final layer, optional bf16 operands --------
    w3p = jnp.pad(w3, ((0, 0), (0, _OUT_PAD - _D_OUT)))
    b3p = jnp.pad(b3, ((0, 0), (0, _OUT_PAD - _D_OUT)))

    x_in = x2.astype(compute_dtype)
    w1c = w1.astype(compute_dtype)
    w2c = w2.astype(compute_dtype)
    w3c = w3p.astype(compute_dtype)
    b1f = b1.astype(jnp.float32)
    b2f = b2.astype(jnp.float32)
    b3f = b3p.astype(jnp.float32)

    # --- cost estimate (advisory) --------------------------------------------
    flops = 2 * B_pad * (_D_IN * _H1 + _H1 * _H2 + _H2 * _OUT_PAD)
    bytes_accessed = (
        x_in.size * x_in.dtype.itemsize
        + B_pad * _OUT_PAD * 4
        + sum(a.size * a.dtype.itemsize for a in (w1c, w2c, w3c, b1f, b2f, b3f))
    )
    cost = pl.CostEstimate(flops=flops, transcendentals=0,
                           bytes_accessed=bytes_accessed)

    out_padded = pl.pallas_call(
        mlp_kernel,
        out_shape=jax.ShapeDtypeStruct((B_pad, _OUT_PAD), jnp.float32),
        grid_spec=pltpu.PrefetchScalarGridSpec(
            num_scalar_prefetch=0,
            grid=grid,
            in_specs=[
                pl.BlockSpec((tm, _D_IN), lambda i: (i, 0)),        # x tile
                pl.BlockSpec((_D_IN, _H1), lambda i: (0, 0)),       # w1 (resident)
                pl.BlockSpec((1, _H1), lambda i: (0, 0)),           # b1
                pl.BlockSpec((_H1, _H2), lambda i: (0, 0)),         # w2 (resident)
                pl.BlockSpec((1, _H2), lambda i: (0, 0)),           # b2
                pl.BlockSpec((_H2, _OUT_PAD), lambda i: (0, 0)),    # w3 padded
                pl.BlockSpec((1, _OUT_PAD), lambda i: (0, 0)),      # b3 padded
            ],
            out_specs=pl.BlockSpec((tm, _OUT_PAD), lambda i: (i, 0)),
        ),
        compiler_params=pltpu.CompilerParams(
            dimension_semantics=("parallel",),   # lets v7x shard grid steps across TCs
        ),
        cost_estimate=cost,
    )(x_in, w1c, b1f, w2c, b2f, w3c, b3f)

    return out_padded[:B, :_D_OUT]


def init_params(key):
    """Deterministic init mirroring nn.Linear default (U[-1/sqrt(fan_in), +])."""
    def linear(k, fan_in, fan_out):
        kw, kb = jax.random.split(k)
        bound = 1.0 / jnp.sqrt(fan_in)
        # stored as (in, out) so forward is x @ W + b
        w = jax.random.uniform(kw, (fan_in, fan_out), jnp.float32, -bound, bound)
        b = jax.random.uniform(kb, (1, fan_out), jnp.float32, -bound, bound)
        return w, b

    k1, k2, k3 = jax.random.split(key, 3)
    w1, b1 = linear(k1, _D_IN, _H1)
    w2, b2 = linear(k2, _H1, _H2)
    w3, b3 = linear(k3, _H2, _D_OUT)
    return (w1, b1, w2, b2, w3, b3)


def reference_forward(x, params):
    w1, b1, w2, b2, w3, b3 = params
    x2 = x.reshape(-1, _D_IN)
    h1 = jnp.maximum(x2 @ w1 + b1, 0.0)
    h2 = jnp.maximum(h1 @ w2 + b2, 0.0)
    return h2 @ w3 + b3


if __name__ == "__main__":
    key = jax.random.PRNGKey(0)
    k_params, k_x = jax.random.split(key)

    params = init_params(k_params)

    # Small input whose flattened batch (B=10) is NOT a multiple of 8 —
    # exercises the cdiv/padding path that replaced the old divisibility assert.
    x = jax.random.normal(k_x, (2, 5, _D_IN), jnp.float32)

    out = simple_nn_forward(x, params)          # f32 operands -> exact vs reference
    out = jax.block_until_ready(out)

    ref = reference_forward(x, params)
    assert out.shape == (10, _D_OUT), out.shape
    assert jnp.allclose(out, ref, atol=1e-5, rtol=1e-5), "mismatch vs reference"

    print("KERNEL_OK")
</pallas_src>

<mosaic_0001>
module attributes {stable_mosaic.version = 11 : i64} {
  func.func @mlp_kernel(%arg0: i32, %arg1: memref<16x6xf32, #tpu.memory_space<vmem>>, %arg2: memref<6x128xf32, #tpu.memory_space<vmem>>, %arg3: memref<1x128xf32, #tpu.memory_space<vmem>>, %arg4: memref<128x64xf32, #tpu.memory_space<vmem>>, %arg5: memref<1x64xf32, #tpu.memory_space<vmem>>, %arg6: memref<64x128xf32, #tpu.memory_space<vmem>>, %arg7: memref<1x128xf32, #tpu.memory_space<vmem>>, %arg8: memref<16x128xf32, #tpu.memory_space<vmem>>) attributes {dimension_semantics = [#tpu.dimension_semantics<parallel>], iteration_bounds = array<i64: 1>, scalar_prefetch = 0 : i64, scratch_operands = 0 : i64, tpu.core_type = #tpu.core_type<tc>, window_params = [{transform_indices = @transform_0, window_bounds = array<i64: 16, 6>}, {pipeline_mode = #tpu.pipeline_mode<synchronous>, transform_indices = @transform_1, window_bounds = array<i64: 6, 128>}, {pipeline_mode = #tpu.pipeline_mode<synchronous>, transform_indices = @transform_2, window_bounds = array<i64: 1, 128>}, {pipeline_mode = #tpu.pipeline_mode<synchronous>, transform_indices = @transform_3, window_bounds = array<i64: 128, 64>}, {pipeline_mode = #tpu.pipeline_mode<synchronous>, transform_indices = @transform_4, window_bounds = array<i64: 1, 64>}, {pipeline_mode = #tpu.pipeline_mode<synchronous>, transform_indices = @transform_5, window_bounds = array<i64: 64, 128>}, {pipeline_mode = #tpu.pipeline_mode<synchronous>, transform_indices = @transform_6, window_bounds = array<i64: 1, 128>}, {transform_indices = @transform_7, window_bounds = array<i64: 16, 128>}]} {
    %c0 = arith.constant 0 : index
    %c0_0 = arith.constant 0 : index
    %0 = vector.load %arg1[%c0, %c0_0] : memref<16x6xf32, #tpu.memory_space<vmem>>, vector<16x6xf32>
    %c0_1 = arith.constant 0 : index
    %c0_2 = arith.constant 0 : index
    %1 = vector.load %arg2[%c0_1, %c0_2] : memref<6x128xf32, #tpu.memory_space<vmem>>, vector<6x128xf32>
    %cst = arith.constant dense<0.000000e+00> : vector<16x128xf32>
    %2 = tpu.matmul %0, %1, %cst {dimension_numbers = #tpu.dot_dimension_numbers<[1], [0], [0], [1], [0, 0, 1, 1], [], []>} : vector<16x6xf32>, vector<6x128xf32>, vector<16x128xf32> -> vector<16x128xf32>
    %c0_3 = arith.constant 0 : index
    %c0_4 = arith.constant 0 : index
    %3 = vector.load %arg3[%c0_3, %c0_4] : memref<1x128xf32, #tpu.memory_space<vmem>>, vector<1x128xf32>
    %4 = vector.broadcast %3 : vector<1x128xf32> to vector<16x128xf32>
    %5 = arith.addf %2, %4 : vector<16x128xf32>
    %cst_5 = arith.constant 0.000000e+00 : f32
    %6 = vector.broadcast %cst_5 : f32 to vector<16x128xf32>
    %7 = arith.maximumf %5, %6 : vector<16x128xf32>
    %c0_6 = arith.constant 0 : index
    %c0_7 = arith.constant 0 : index
    %8 = vector.load %arg4[%c0_6, %c0_7] : memref<128x64xf32, #tpu.memory_space<vmem>>, vector<128x64xf32>
    %cst_8 = arith.constant dense<0.000000e+00> : vector<16x64xf32>
    %9 = tpu.matmul %7, %8, %cst_8 {dimension_numbers = #tpu.dot_dimension_numbers<[1], [0], [0], [1], [0, 0, 1, 1], [], []>} : vector<16x128xf32>, vector<128x64xf32>, vector<16x64xf32> -> vector<16x64xf32>
    %c0_9 = arith.constant 0 : index
    %c0_10 = arith.constant 0 : index
    %10 = vector.load %arg5[%c0_9, %c0_10] : memref<1x64xf32, #tpu.memory_space<vmem>>, vector<1x64xf32>
    %11 = vector.broadcast %10 : vector<1x64xf32> to vector<16x64xf32>
    %12 = arith.addf %9, %11 : vector<16x64xf32>
    %cst_11 = arith.constant 0.000000e+00 : f32
    %13 = vector.broadcast %cst_11 : f32 to vector<16x64xf32>
    %14 = arith.maximumf %12, %13 : vector<16x64xf32>
    %c0_12 = arith.constant 0 : index
    %c0_13 = arith.constant 0 : index
    %15 = vector.load %arg6[%c0_12, %c0_13] : memref<64x128xf32, #tpu.memory_space<vmem>>, vector<64x128xf32>
    %cst_14 = arith.constant dense<0.000000e+00> : vector<16x128xf32>
    %16 = tpu.matmul %14, %15, %cst_14 {dimension_numbers = #tpu.dot_dimension_numbers<[1], [0], [0], [1], [0, 0, 1, 1], [], []>} : vector<16x64xf32>, vector<64x128xf32>, vector<16x128xf32> -> vector<16x128xf32>
    %c0_15 = arith.constant 0 : index
    %c0_16 = arith.constant 0 : index
    %17 = vector.load %arg7[%c0_15, %c0_16] : memref<1x128xf32, #tpu.memory_space<vmem>>, vector<1x128xf32>
    %18 = vector.broadcast %17 : vector<1x128xf32> to vector<16x128xf32>
    %19 = arith.addf %16, %18 : vector<16x128xf32>
    %c0_17 = arith.constant 0 : index
    %c0_18 = arith.constant 0 : index
    %20 = vector.load %arg8[%c0_17, %c0_18] : memref<16x128xf32, #tpu.memory_space<vmem>>, vector<16x128xf32>
    tpu.vector_store %arg8[%c0_17, %c0_18], %19 {strides = array<i32>} : memref<16x128xf32, #tpu.memory_space<vmem>>, vector<16x128xf32>,
    return
  }
  func.func @transform_0(%arg0: i32) -> (i32, i32) {
    %c0_i32 = arith.constant 0 : i32
    %c0_i32_0 = arith.constant 0 : i32
    return %arg0, %c0_i32 : i32, i32
  }
  func.func @transform_1(%arg0: i32) -> (i32, i32) {
    %c0_i32 = arith.constant 0 : i32
    %c0_i32_0 = arith.constant 0 : i32
    %c0_i32_1 = arith.constant 0 : i32
    return %c0_i32, %c0_i32_0 : i32, i32
  }
  func.func @transform_2(%arg0: i32) -> (i32, i32) {
    %c0_i32 = arith.constant 0 : i32
    %c0_i32_0 = arith.constant 0 : i32
    %c0_i32_1 = arith.constant 0 : i32
    return %c0_i32, %c0_i32_0 : i32, i32
  }
  func.func @transform_3(%arg0: i32) -> (i32, i32) {
    %c0_i32 = arith.constant 0 : i32
    %c0_i32_0 = arith.constant 0 : i32
    %c0_i32_1 = arith.constant 0 : i32
    return %c0_i32, %c0_i32_0 : i32, i32
  }
  func.func @transform_4(%arg0: i32) -> (i32, i32) {
    %c0_i32 = arith.constant 0 : i32
    %c0_i32_0 = arith.constant 0 : i32
    %c0_i32_1 = arith.constant 0 : i32
    return %c0_i32, %c0_i32_0 : i32, i32
  }
  func.func @transform_5(%arg0: i32) -> (i32, i32) {
    %c0_i32 = arith.constant 0 : i32
    %c0_i32_0 = arith.constant 0 : i32
    %c0_i32_1 = arith.constant 0 : i32
    return %c0_i32, %c0_i32_0 : i32, i32
  }
  func.func @transform_6(%arg0: i32) -> (i32, i32) {
    %c0_i32 = arith.constant 0 : i32
    %c0_i32_0 = arith.constant 0 : i32
    %c0_i32_1 = arith.constant 0 : i32
    return %c0_i32, %c0_i32_0 : i32, i32
  }
  func.func @transform_7(%arg0: i32) -> (i32, i32) {
    %c0_i32 = arith.constant 0 : i32
    %c0_i32_0 = arith.constant 0 : i32
    return %arg0, %c0_i32 : i32, i32
  }
}

</mosaic_0001>

<bundles_post_ra>
// kernel: tpu_custom_call.1
= control target key start
LH: loop header
LB: loop body
LE: loop exit
PB: predicated region body
PF: predicated region fallthrough
CT: control target
= control target key end

     0   :  { %vm44_vm0 = vcmask 1045504   ;;  %vm37_vm1 = vcmask 48128   ;;  %s658_s0 = inlined_call_operand.vmem [shape: f32[16,6], index: 0, kind: input, shape index: {}]   ;;  %s659_s1 = inlined_call_operand.vmem [shape: f32[6,128], index: 1, kind: input, shape index: {}]   ;;  %s660_s2 = inlined_call_operand.vmem [shape: f32[1,128], index: 2, kind: input, shape index: {}]   ;;  %s661_s3 = inlined_call_operand.vmem [shape: f32[128,64], index: 3, kind: input, shape index: {}]   ;;  %s662_s4 = inlined_call_operand.vmem [shape: f32[1,64], index: 4, kind: input, shape index: {}]   ;;  %s663_s5 = inlined_call_operand.vmem [shape: f32[64,128], index: 5, kind: input, shape index: {}]   ;;  %s664_s6 = inlined_call_operand.vmem [shape: f32[1,128], index: 6, kind: input, shape index: {}]   ;;  %s665_s7 = inlined_call_operand.hbm [shape: f32[16,128], index: 7, kind: output, shape index: {}]  }
   0x1   :  { %v29_v0 = vld [vmem:[%s659_s1] sm:$0x3f]  ;;  %v28_v2 = vld [vmem:[%s658_s0 + $0x8] sm:$0xff]  ;;  %v127_v5 = vld [vmem:[%s661_s3 + $0x10] sm:$0xff] }
   0x2   :  { %v27_v1 = vld [vmem:[%s658_s0] sm:$0xff]  ;;  %379 = vmatprep.subr.msk.mxu0 %vm44_vm0, %v29_v0  ;;  %v126_v4 = vld [vmem:[%s661_s3 + $0x8] sm:$0xff]  ;;  %v128_v7 = vld [vmem:[%s661_s3 + $0x18] sm:$0xff] }
   0x3   :  { %381 = vmatprep.mubr.msk.f32.mxu0 %vm37_vm1, %v27_v1  ;;  %v125_v3 = vld [vmem:[%s661_s3] sm:$0xff]  ;;  %380 = vmatpush3.msk.msra.mxu0 %vm44_vm0, %v29_v0  ;;  %v442_v8 = vpack.c.bf16 %v128_v7, %v127_v5  ;;  %v130_v10 = vld [vmem:[%s661_s3 + $0x28] sm:$0xff] }
   0x4   :  { %v438_v6 = vpack.c.bf16 %v126_v4, %v125_v3  ;;  %382 = vmatmul.mubr.msk.f32.vlgmr.msra.gmra.mrb[0].mxu0 %vm37_vm1, %v28_v2  ;;  %v129_v9 = vld [vmem:[%s661_s3 + $0x20] sm:$0xff] }
   0x6   :  { %439 = vmatprep.subr.bf16.mxu1 %v438_v6 }
   0x7   :  { %441 = vmatpush3.bf16.msra.mxu1 %v438_v6 }
   0x8   :  { %12 = vsyncpa [#allocation3], 0  ;;  %443 = vmatprep.subr.bf16.mxu1 %v442_v8  ;;  %v446_v11 = vpack.c.bf16 %v130_v10, %v129_v9  ;;  %v131_v12 = vld [vmem:[%s661_s3 + $0x30] sm:$0xff]  ;;  %v132_v13 = vld [vmem:[%s661_s3 + $0x38] sm:$0xff]  ;;  %vm240_vm2 = vcmask 523264  }
   0x9   :  { %v450_v14 = vpack.c.bf16 %v132_v13, %v131_v12  ;;  %v133_v15 = vld [vmem:[%s661_s3 + $0x40] sm:$0xff]  ;;  %v134_v16 = vld [vmem:[%s661_s3 + $0x48] sm:$0xff]  ;;  %v135_v18 = vld [vmem:[%s661_s3 + $0x50] sm:$0xff] }
   0xa   :  { %v454_v17 = vpack.c.bf16 %v134_v16, %v133_v15  ;;  %v136_v19 = vld [vmem:[%s661_s3 + $0x58] sm:$0xff]  ;;  %v137_v21 = vld [vmem:[%s661_s3 + $0x60] sm:$0xff]  ;;  %v138_v22 = vld [vmem:[%s661_s3 + $0x68] sm:$0xff] }
   0xb   :  { %445 = vmatpush3.bf16.msra.mxu1 %v442_v8  ;;  %v458_v20 = vpack.c.bf16 %v136_v19, %v135_v18  ;;  %v462_v23 = vpack.c.bf16 %v138_v22, %v137_v21  ;;  %v139_v24 = vld [vmem:[%s661_s3 + $0x70] sm:$0xff]  ;;  %v140_v25 = vld [vmem:[%s661_s3 + $0x78] sm:$0xff]  ;;  %v225_v27 = vld [vmem:[%s663_s5] sm:$0xff] }
   0xc   :  { %447 = vmatprep.subr.bf16.mxu1 %v446_v11  ;;  %v466_v26 = vpack.c.bf16 %v140_v25, %v139_v24  ;;  %v226_v28 = vld [vmem:[%s663_s5 + $0x8] sm:$0xff]  ;;  %v227_v29 = vld [vmem:[%s663_s5 + $0x10] sm:$0xff]  ;;  %v228_v31 = vld [vmem:[%s663_s5 + $0x18] sm:$0xff] }
   0xd   :  { %v470_v30 = vpack.c.bf16 %v226_v28, %v225_v27  ;;  %v474_v32 = vpack.c.bf16 %v228_v31, %v227_v29  ;;  %v229_v33 = vld [vmem:[%s663_s5 + $0x20] sm:$0xff]  ;;  %v230_v34 = vld [vmem:[%s663_s5 + $0x28] sm:$0xff]  ;;  %v231_v43 = vld [vmem:[%s663_s5 + $0x30] sm:$0xff] }
   0xe   :  { %v478_v35 = vpack.c.bf16 %v230_v34, %v229_v33  ;;  %v340_v36 = vld [vmem:[%s660_s2] ss:$0 sm:$0xff]  ;;  %v232_v44 = vld [vmem:[%s663_s5 + $0x38] sm:$0xff]  ;;  %s513_s5 = smov [#allocation2]  }
   0xf   :  { %449 = vmatpush3.bf16.msra.mxu1 %v446_v11  ;;  %471 = vmatprep.subr.bf16.mxu0 %v470_v30  ;;  %v482_v45 = vpack.c.bf16 %v232_v44, %v231_v43  ;;  %v344_v46 = vld [vmem:[%s662_s4] ss:$0 sm:$0xff]  ;;  %s329_s9 = sshll.u32 %s513_s5, 4  ;;  %s330_s9 = int_to_ptr.vmem [resolvable:$true] %s329_s9 }
  0x10   :  { %451 = vmatprep.subr.bf16.mxu1 %v450_v14  ;;  %473 = vmatpush3.bf16.msra.mxu0 %v470_v30  ;;  %v345_v53 = vld [vmem:[%s664_s6] ss:$0 sm:$0xff]  ;;  %s489_s4 = scalar_lea.vmem %s330_s9, 256  ;;  %p494_p1 = scmp.lt.s32.totalorder %s330_s9, %s330_s9 }
  0x11   :  { %475 = vmatprep.subr.bf16.mxu0 %v474_v32  ;;  %p490_p0 = scmp.ne.s32.totalorder %s330_s9, %s489_s4  ;;  %p495_p2 = scmp.lt.s32.totalorder %s489_s4, %s489_s4 }
  0x13   :  { %453 = vmatpush3.bf16.msra.mxu1 %v450_v14  ;;  %p496_p3 = por %p495_p2, %p494_p1 }
  0x14   :  { %455 = vmatprep.subr.bf16.mxu1 %v454_v17  ;;  %477 = vmatpush3.bf16.msra.mxu0 %v474_v32 }
  0x15   :  { %479 = vmatprep.subr.bf16.mxu0 %v478_v35  ;;  %p497_p4 = pnand %p496_p3, %p490_p0 }
  0x17   :  { %457 = vmatpush3.bf16.msra.mxu1 %v454_v17 }
  0x18   :  { %459 = vmatprep.subr.bf16.mxu1 %v458_v20  ;;  %481 = vmatpush3.bf16.msra.mxu0 %v478_v35 }
  0x19   :  { %483 = vmatprep.subr.bf16.mxu0 %v482_v45 }
  0x1b   :  { %461 = vmatpush3.bf16.msra.mxu1 %v458_v20 }
  0x1c   :  { %463 = vmatprep.subr.bf16.mxu1 %v462_v23  ;;  %485 = vmatpush3.bf16.msra.mxu0 %v482_v45 }
  0x1f   :  { %465 = vmatpush3.bf16.msra.mxu1 %v462_v23 }
  0x20   :  { %467 = vmatprep.subr.bf16.mxu1 %v466_v26 }
  0x23   :  { %469 = vmatpush3.bf16.msra.mxu1 %v466_v26 }
  0xd7   :  { %v383_v37 = vpop.f32.mrb[0].mxu0 }
  0xd8   :  { %v120_v38 = vadd.f32 %v383_v37, %v340_v36  ;;  %v114_v39 = vpop.f32.mrb[1].mxu0 }
  0xd9   :  { %v115_v40 = vadd.f32 %v340_v36, %v114_v39 }
  0xda   :  { %v124_v42 = vmax.f32 %v120_v38, 0.0 }
  0xdb   :  { %v123_v41 = vmax.f32 %v115_v40, 0.0 }
  0xdd   :  { %416 = vmatprep.mubr.f32.mxu1 %v123_v41 }
  0xde   :  { %417 = vmatmul.mubr.f32.vlgmr.msra.gmra.mrb[0].mxu1 %v124_v42 }
 0x1b1   :  { %v418_v47 = vpop.f32.mrb[0].mxu1 }
 0x1b2   :  { %v220_v48 = vadd.f32 %v418_v47, %v344_v46  ;;  %v214_v49 = vpop.f32.mrb[1].mxu1 }
 0x1b3   :  { %v215_v50 = vadd.f32 %v344_v46, %v214_v49 }
 0x1b4   :  { %v224_v52 = vmax.f32 %v220_v48, 0.0 }
 0x1b5   :  { %v223_v51 = vmax.f32 %v215_v50, 0.0 }
 0x1b7   :  { %435 = vmatprep.mubr.msk.f32.mxu0 %vm240_vm2, %v223_v51 }
 0x1b8   :  { %436 = vmatmul.mubr.msk.f32.vlgmr.msra.gmra.mrb[2].mxu0 %vm240_vm2, %v224_v52 }
 0x28b   :  { %v437_v54 = vpop.f32.mrb[2].mxu0 }
 0x28c   :  { %v319_v55 = vadd.f32 %v437_v54, %v345_v53  ;;  %v313_v56 = vpop.f32.mrb[3].mxu0 }
 0x28d   :  { %v314_v57 = vadd.f32 %v345_v53, %v313_v56 }
 0x28e   :  { %323 = vst [vmem:[#allocation2 + $0x8] sm:$0xff] %v319_v55 }
 0x28f   :  { %322 = vst [vmem:[#allocation2] sm:$0xff] %v314_v57 }
 0x290   :  { %500 = shalt.err (!%p497_p4)
}
 0x291   :  { %s501_s6 = scalar_lea.hbm %s665_s7, 256 }
 0x292   :  { %p502_p5 = scmp.ne.s32.totalorder %s665_s7, %s501_s6  ;;  %p505_p6 = scmp.lt.u32.totalorder %s501_s6, %s665_s7 }
 0x294   :  { %p507_p7 = pnand %p505_p6, %p502_p5 }
 0x296   :  { %510 = shalt.err (!%p507_p7)
}
 0x297   :  { %s514_s14 = smov 128   ;;  %s515_s15 = smov 8  }
 0x298   :  { %335 = dma.vmem_to_hbm [thread:$0]  %s330_s9, 256, %s665_s7, [#allocation3], %s514_s14, %s514_s14, %s515_s15  }
 0x299   :  { %511 = dma.done.wait [#allocation3], 256  }
 0x29a   :  { %512 = vsyncadd [#allocation3], 4294967040 }
 0x29b   :  { %339 = vsyncpa [#allocation3], 1 }

</bundles_post_ra>
